<compile_context>
chip_gen: v6e
topology: v6e:2x2x1
jax: 0.10.0
libtpu: 0.0.40
codegen_flags: <defaults>
</compile_context>

<pallas_src>
import jax
import jax.numpy as jnp
from jax.experimental import pallas as pl
from jax.experimental.pallas import tpu as pltpu


def _ceil_div(a, b):
    return -(-a // b)


def _round_up(a, m):
    return _ceil_div(a, m) * m


def _weight_selector_kernel(xt_ref, wtap_ref, bconv_ref, wlt_ref, gsumt_ref, out_ref):
    """One batch block per grid step.

    xt_ref   : (Bblk, Lp, D*Cin)   bf16  padded input, xt[b, l, d*Cin+i] = xpad[b,d,i,l]
    wtap_ref : (K, D*Cin, D*Cout)  bf16  per-tap block-diag-over-depth conv weight
    bconv_ref: (1, D*Cout)         f32   conv bias row
    wlt_ref  : (L, D*Cout)         f32   Linear weight mapped to y's (l, d*Cout+o) layout
    gsumt_ref: (D*Cout, D)         f32   per-depth group-sum matrix (MXU Cout reduction)
    out_ref  : (Bblk, D)           f32   softmax weights over depth (lane-dense row)
    """
    Bblk, Lp, DCin = xt_ref.shape
    K = wtap_ref.shape[0]
    L, DCout = wlt_ref.shape
    D = gsumt_ref.shape[1]

    # In-kernel im2col: load the bf16 tile once, upcast so the odd-offset
    # sublane tap slices happen on a 32-bit value (robust lowering), then cast
    # each tap back to bf16 for the MXU.  K per-tap matmuls accumulate in f32.
    xfull = xt_ref[...].astype(jnp.float32)                       # (Bblk, Lp, D*Cin)
    acc = None
    for k in range(K):                                            # static -> unrolled
        xk = xfull[:, k:k + L, :].reshape(Bblk * L, DCin)
        yk = jnp.dot(xk.astype(jnp.bfloat16), wtap_ref[k],
                     preferred_element_type=jnp.float32)          # (Bblk*L, D*Cout)
        acc = yk if acc is None else acc + yk
    y = jnp.maximum(acc + bconv_ref[...], 0.0)                    # bias + ReLU (f32, VPU)

    # Linear(out_channels*h_units -> 1): per-(l,o) weight broadcast over batch
    # (no HBM-tiled welt), then Cout group-sum on the MXU, then L sum (sublane).
    # NOTE: Linear bias dropped — softmax over depth is shift-invariant.
    y3 = y.reshape(Bblk, L, DCout)
    z = (y3 * wlt_ref[...]).reshape(Bblk * L, DCout)              # (Bblk*L, D*Cout)
    t = jnp.dot(z, gsumt_ref[...],
                preferred_element_type=jnp.float32)               # (Bblk*L, D)
    scores = jnp.sum(t.reshape(Bblk, L, D), axis=1)               # (Bblk, D)

    # Softmax over depth (lane axis of a (Bblk, D) row tile).
    m = jnp.max(scores, axis=-1, keepdims=True)
    p = jnp.exp(scores - m)
    denom = jnp.sum(p, axis=-1, keepdims=True)
    inv = pl.reciprocal(denom, approx=True)                       # EUP slot
    inv = inv * (2.0 - denom * inv)                               # 1 Newton step -> f32 accurate
    out_ref[...] = p * inv


def prepare_weight_selector_params(params):
    """Build the parameter-derived kernel operands ONCE (cache across calls)."""
    Wc = params["conv_w"].astype(jnp.float32)     # (D, Cout, Cin, K)
    bc = params["conv_b"].astype(jnp.float32)     # (D, Cout)
    wl = params["lin_w"].astype(jnp.float32)      # (Cout * L,)
    D, Cout, Cin, K = Wc.shape
    L = wl.shape[0] // Cout

    eye_d = jnp.eye(D, dtype=jnp.float32)
    # Per-tap block-diagonal-over-depth conv weight:
    #   wtap[k, e*Cin+i, d*Cout+o] = Wc[d, o, i, k] * [d == e]
    # TODO(synk): block-diag layout wastes D x MXU work once K*D*Cin or D*Cout
    #             exceeds one MXU tile; at these sizes (32 x 64) it is free.
    wtap = jnp.einsum('doik,de->keido', Wc, eye_d).reshape(K, D * Cin, D * Cout)
    wtap = wtap.astype(jnp.bfloat16)
    bconv = bc.reshape(1, D * Cout)
    # Linear weight mapped to the kernel's (l, d*Cout+o) layout (tiny: L x D*Cout):
    #   wlt[l, d*Cout+o] = wl[o*L + l]
    wlt = jnp.tile(wl.reshape(Cout, L).T, (1, D))                 # (L, D*Cout)
    # Per-depth group-sum matrix (Cout reduction runs on the MXU).
    gsumt = jnp.repeat(eye_d, Cout, axis=0)                       # (D*Cout, D)
    return {"wtap": wtap, "bconv": bconv, "wlt": wlt, "gsumt": gsumt}


def weight_selector_pallas(x, prepped, block_b=None):
    """x: (B, depth, in_channels, h_units) f32 -> (B, depth, 1) f32."""
    B, D, Cin, L = x.shape
    wtap, bconv, wlt, gsumt = (prepped["wtap"], prepped["bconv"],
                               prepped["wlt"], prepped["gsumt"])
    K = wtap.shape[0]
    DCout = wtap.shape[2]
    assert wlt.shape[0] == L, "lin_w length inconsistent with h_units"
    pad = (K - 1) // 2            # length-preserving for odd K
    Lp = L + 2 * pad

    # Batch blocking: whole batch in one step for tiny B; for large B produce
    # >= 4 blocks (2 per TensorCore on v7x) with block_b a multiple of 8.
    if block_b is None:
        block_b = B if B <= 8 else max(8, _round_up(_ceil_div(B, 4), 8))
    nblk = _ceil_div(B, block_b)
    if nblk > 1 and block_b % 8 != 0:     # (8,128) rule on the (block_b, D) output block
        block_b = _round_up(block_b, 8)
        nblk = _ceil_div(B, block_b)
    Bp = nblk * block_b

    # ---- glue (plain JAX): pad + one layout transpose, NO Kx im2col inflation ----
    xp = jnp.pad(x.astype(jnp.float32), ((0, 0), (0, 0), (0, 0), (pad, pad)))
    xt = jnp.transpose(xp, (0, 3, 1, 2)).reshape(B, Lp, D * Cin)  # xt[b,l,d*Cin+i]
    xt = jnp.pad(xt, ((0, Bp - B), (0, 0), (0, 0))).astype(jnp.bfloat16)

    # Explicit VMEM budget (double-buffered xt tile + constants + live intermediates).
    xt_tile = block_b * Lp * D * Cin * 2
    const_bytes = (K * D * Cin * DCout * 2 + (1 + L) * DCout * 4 + DCout * D * 4)
    interm = (block_b * Lp * D * Cin * 4            # f32 upcast of the tile
              + 3 * block_b * L * DCout * 4         # acc / y / z
              + block_b * L * D * 4)                # t
    vmem_limit = 2 * xt_tile + 2 * const_bytes + 2 * block_b * D * 4 + 2 * interm + (1 << 20)
    vmem_limit = int(min(max(vmem_limit, 32 << 20), 112 << 20))

    out = pl.pallas_call(
        _weight_selector_kernel,
        out_shape=jax.ShapeDtypeStruct((Bp, D), jnp.float32),
        grid_spec=pltpu.PrefetchScalarGridSpec(
            num_scalar_prefetch=0,
            grid=(nblk,),
            in_specs=[
                pl.BlockSpec((block_b, Lp, D * Cin), lambda b: (b, 0, 0)),
                pl.BlockSpec((K, D * Cin, DCout), lambda b: (0, 0, 0)),
                pl.BlockSpec((1, DCout), lambda b: (0, 0)),
                pl.BlockSpec((L, DCout), lambda b: (0, 0)),
                pl.BlockSpec((DCout, D), lambda b: (0, 0)),
            ],
            out_specs=pl.BlockSpec((block_b, D), lambda b: (b, 0)),
        ),
        compiler_params=pltpu.CompilerParams(
            dimension_semantics=("parallel",),
            vmem_limit_bytes=vmem_limit),
    )(xt, wtap, bconv, wlt, gsumt)

    # Kernel output is (B, D); module returns (B, D, 1).
    return out[:B].reshape(B, D, 1)


def weight_selector_reference(x, params, *, bf16_inputs=False):
    """Pure-JAX reference of the PyTorch forward."""
    Wc = params["conv_w"].astype(jnp.float32)
    bc = params["conv_b"].astype(jnp.float32)
    wl = params["lin_w"].astype(jnp.float32)
    bl = params["lin_b"].astype(jnp.float32)
    if bf16_inputs:   # mimic the kernel's bf16 matmul-operand rounding
        x = x.astype(jnp.bfloat16).astype(jnp.float32)
        Wc = Wc.astype(jnp.bfloat16).astype(jnp.float32)
    B, D, Cin, L = x.shape
    Cout, K = Wc.shape[1], Wc.shape[3]
    pad = (K - 1) // 2
    xpad = jnp.pad(x.astype(jnp.float32), ((0, 0), (0, 0), (0, 0), (pad, pad)))
    y = jnp.zeros((B, D, Cout, L), jnp.float32)
    for k in range(K):
        y = y + jnp.einsum('bdil,doi->bdol', xpad[..., k:k + L], Wc[..., k],
                           preferred_element_type=jnp.float32)
    y = jnp.maximum(y + bc[None, :, :, None], 0.0)            # ReLU
    flat = y.reshape(B, D, Cout * L)                          # x.view(*size[:2], -1)
    scores = flat @ wl + bl                                   # Linear(h_units*out_channels, 1)
    return jax.nn.softmax(scores, axis=1)[..., None]          # Softmax(dim=1)


if __name__ == "__main__":
    B, D, Cin, Cout, L, K = 2, 8, 4, 8, 16, 3   # depth=8, h_units=16

    key = jax.random.PRNGKey(0)
    k1, k2, k3, k4, k5 = jax.random.split(key, 5)
    params = {
        "conv_w": 0.1 * jax.random.normal(k1, (D, Cout, Cin, K), jnp.float32),
        "conv_b": 0.1 * jax.random.normal(k2, (D, Cout), jnp.float32),
        "lin_w":  0.1 * jax.random.normal(k3, (Cout * L,), jnp.float32),
        "lin_b":  0.1 * jax.random.normal(k4, (), jnp.float32),
    }
    x = jax.random.normal(k5, (B, D, Cin, L), jnp.float32)

    prepped = prepare_weight_selector_params(params)          # build once, reuse per call
    out = jax.block_until_ready(weight_selector_pallas(x, prepped))

    ref_match = jax.block_until_ready(
        weight_selector_reference(x, params, bf16_inputs=True))   # same bf16 rounding
    ref_f32 = jax.block_until_ready(weight_selector_reference(x, params))

    assert out.shape == (B, D, 1), out.shape
    assert jnp.allclose(out, ref_match, atol=5e-5, rtol=1e-4), (out, ref_match)
    assert jnp.allclose(out, ref_f32, atol=5e-2, rtol=5e-2), (out, ref_f32)
    assert jnp.allclose(jnp.sum(out, axis=1), 1.0, atol=1e-5)   # softmax over depth sums to 1

    print("KERNEL_OK")
</pallas_src>

<mosaic_0001>
module attributes {stable_mosaic.version = 11 : i64} {
  func.func @_weight_selector_kernel(%arg0: i32, %arg1: memref<2x18x32xbf16, #tpu.memory_space<vmem>>, %arg2: memref<3x32x64xbf16, #tpu.memory_space<vmem>>, %arg3: memref<1x64xf32, #tpu.memory_space<vmem>>, %arg4: memref<16x64xf32, #tpu.memory_space<vmem>>, %arg5: memref<64x8xf32, #tpu.memory_space<vmem>>, %arg6: memref<2x8xf32, #tpu.memory_space<vmem>>) attributes {dimension_semantics = [#tpu.dimension_semantics<parallel>], iteration_bounds = array<i64: 1>, scalar_prefetch = 0 : i64, scratch_operands = 0 : i64, tpu.core_type = #tpu.core_type<tc>, window_params = [{transform_indices = @transform_0, window_bounds = array<i64: 2, 18, 32>}, {pipeline_mode = #tpu.pipeline_mode<synchronous>, transform_indices = @transform_1, window_bounds = array<i64: 3, 32, 64>}, {pipeline_mode = #tpu.pipeline_mode<synchronous>, transform_indices = @transform_2, window_bounds = array<i64: 1, 64>}, {pipeline_mode = #tpu.pipeline_mode<synchronous>, transform_indices = @transform_3, window_bounds = array<i64: 16, 64>}, {pipeline_mode = #tpu.pipeline_mode<synchronous>, transform_indices = @transform_4, window_bounds = array<i64: 64, 8>}, {transform_indices = @transform_5, window_bounds = array<i64: 2, 8>}]} {
    %c0 = arith.constant 0 : index
    %c0_0 = arith.constant 0 : index
    %c0_1 = arith.constant 0 : index
    %0 = vector.load %arg1[%c0, %c0_0, %c0_1] : memref<2x18x32xbf16, #tpu.memory_space<vmem>>, vector<2x18x32xbf16>
    %1 = arith.extf %0 : vector<2x18x32xbf16> to vector<2x18x32xf32>
    %2 = vector.extract_strided_slice %1 {offsets = [0, 0, 0], sizes = [2, 16, 32], strides = [1, 1, 1]} : vector<2x18x32xf32> to vector<2x16x32xf32>
    %3 = vector.shape_cast %2 : vector<2x16x32xf32> to vector<32x32xf32>
    %4 = arith.truncf %3 : vector<32x32xf32> to vector<32x32xbf16>
    %c0_2 = arith.constant 0 : index
    %c0_3 = arith.constant 0 : index
    %c0_4 = arith.constant 0 : index
    %5 = vector.load %arg2[%c0_2, %c0_3, %c0_4] : memref<3x32x64xbf16, #tpu.memory_space<vmem>>, vector<1x32x64xbf16>
    %6 = vector.shape_cast %5 : vector<1x32x64xbf16> to vector<32x64xbf16>
    %cst = arith.constant dense<0.000000e+00> : vector<32x64xf32>
    %7 = tpu.matmul %4, %6, %cst {dimension_numbers = #tpu.dot_dimension_numbers<[1], [0], [0], [1], [0, 0, 1, 1], [], []>} : vector<32x32xbf16>, vector<32x64xbf16>, vector<32x64xf32> -> vector<32x64xf32>
    %8 = vector.extract_strided_slice %1 {offsets = [0, 1, 0], sizes = [2, 16, 32], strides = [1, 1, 1]} : vector<2x18x32xf32> to vector<2x16x32xf32>
    %9 = vector.shape_cast %8 : vector<2x16x32xf32> to vector<32x32xf32>
    %10 = arith.truncf %9 : vector<32x32xf32> to vector<32x32xbf16>
    %c1 = arith.constant 1 : index
    %c0_5 = arith.constant 0 : index
    %c0_6 = arith.constant 0 : index
    %11 = vector.load %arg2[%c1, %c0_5, %c0_6] : memref<3x32x64xbf16, #tpu.memory_space<vmem>>, vector<1x32x64xbf16>
    %12 = vector.shape_cast %11 : vector<1x32x64xbf16> to vector<32x64xbf16>
    %cst_7 = arith.constant dense<0.000000e+00> : vector<32x64xf32>
    %13 = tpu.matmul %10, %12, %cst_7 {dimension_numbers = #tpu.dot_dimension_numbers<[1], [0], [0], [1], [0, 0, 1, 1], [], []>} : vector<32x32xbf16>, vector<32x64xbf16>, vector<32x64xf32> -> vector<32x64xf32>
    %14 = arith.addf %7, %13 : vector<32x64xf32>
    %15 = vector.extract_strided_slice %1 {offsets = [0, 2, 0], sizes = [2, 16, 32], strides = [1, 1, 1]} : vector<2x18x32xf32> to vector<2x16x32xf32>
    %16 = vector.shape_cast %15 : vector<2x16x32xf32> to vector<32x32xf32>
    %17 = arith.truncf %16 : vector<32x32xf32> to vector<32x32xbf16>
    %c2 = arith.constant 2 : index
    %c0_8 = arith.constant 0 : index
    %c0_9 = arith.constant 0 : index
    %18 = vector.load %arg2[%c2, %c0_8, %c0_9] : memref<3x32x64xbf16, #tpu.memory_space<vmem>>, vector<1x32x64xbf16>
    %19 = vector.shape_cast %18 : vector<1x32x64xbf16> to vector<32x64xbf16>
    %cst_10 = arith.constant dense<0.000000e+00> : vector<32x64xf32>
    %20 = tpu.matmul %17, %19, %cst_10 {dimension_numbers = #tpu.dot_dimension_numbers<[1], [0], [0], [1], [0, 0, 1, 1], [], []>} : vector<32x32xbf16>, vector<32x64xbf16>, vector<32x64xf32> -> vector<32x64xf32>
    %21 = arith.addf %14, %20 : vector<32x64xf32>
    %c0_11 = arith.constant 0 : index
    %c0_12 = arith.constant 0 : index
    %22 = vector.load %arg3[%c0_11, %c0_12] : memref<1x64xf32, #tpu.memory_space<vmem>>, vector<1x64xf32>
    %23 = vector.broadcast %22 : vector<1x64xf32> to vector<32x64xf32>
    %24 = arith.addf %21, %23 : vector<32x64xf32>
    %cst_13 = arith.constant 0.000000e+00 : f32
    %25 = vector.broadcast %cst_13 : f32 to vector<32x64xf32>
    %26 = arith.maximumf %24, %25 : vector<32x64xf32>
    %27 = vector.shape_cast %26 : vector<32x64xf32> to vector<2x16x64xf32>
    %c0_14 = arith.constant 0 : index
    %c0_15 = arith.constant 0 : index
    %28 = vector.load %arg4[%c0_14, %c0_15] : memref<16x64xf32, #tpu.memory_space<vmem>>, vector<16x64xf32>
    %29 = vector.shape_cast %28 : vector<16x64xf32> to vector<1x16x64xf32>
    %30 = vector.broadcast %29 : vector<1x16x64xf32> to vector<2x16x64xf32>
    %31 = arith.mulf %27, %30 : vector<2x16x64xf32>
    %32 = vector.shape_cast %31 : vector<2x16x64xf32> to vector<32x64xf32>
    %c0_16 = arith.constant 0 : index
    %c0_17 = arith.constant 0 : index
    %33 = vector.load %arg5[%c0_16, %c0_17] : memref<64x8xf32, #tpu.memory_space<vmem>>, vector<64x8xf32>
    %cst_18 = arith.constant dense<0.000000e+00> : vector<32x8xf32>
    %34 = tpu.matmul %32, %33, %cst_18 {dimension_numbers = #tpu.dot_dimension_numbers<[1], [0], [0], [1], [0, 0, 1, 1], [], []>} : vector<32x64xf32>, vector<64x8xf32>, vector<32x8xf32> -> vector<32x8xf32>
    %35 = vector.shape_cast %34 : vector<32x8xf32> to vector<2x16x8xf32>
    %cst_19 = arith.constant dense<0.000000e+00> : vector<2x8xf32>
    %36 = vector.multi_reduction <add>, %35, %cst_19 [1] : vector<2x16x8xf32> to vector<2x8xf32>
    %cst_20 = arith.constant dense<0xFF800000> : vector<2xf32>
    %37 = vector.multi_reduction <maximumf>, %36, %cst_20 [1] : vector<2x8xf32> to vector<2xf32>
    %38 = vector.shape_cast %37 : vector<2xf32> to vector<2x1xf32>
    %39 = vector.broadcast %38 : vector<2x1xf32> to vector<2x8xf32>
    %40 = arith.subf %36, %39 : vector<2x8xf32>
    %41 = math.exp %40 : vector<2x8xf32>
    %cst_21 = arith.constant dense<0.000000e+00> : vector<2xf32>
    %42 = vector.multi_reduction <add>, %41, %cst_21 [1] : vector<2x8xf32> to vector<2xf32>
    %43 = vector.shape_cast %42 : vector<2xf32> to vector<2x1xf32>
    %44 = tpu.reciprocal %43 {approx = true} : vector<2x1xf32> -> vector<2x1xf32>
    %45 = arith.mulf %43, %44 : vector<2x1xf32>
    %cst_22 = arith.constant 2.000000e+00 : f32
    %46 = vector.broadcast %cst_22 : f32 to vector<2x1xf32>
    %47 = arith.subf %46, %45 : vector<2x1xf32>
    %48 = arith.mulf %44, %47 : vector<2x1xf32>
    %49 = vector.broadcast %48 : vector<2x1xf32> to vector<2x8xf32>
    %50 = arith.mulf %41, %49 : vector<2x8xf32>
    %c0_23 = arith.constant 0 : index
    %c0_24 = arith.constant 0 : index
    %51 = vector.load %arg6[%c0_23, %c0_24] : memref<2x8xf32, #tpu.memory_space<vmem>>, vector<2x8xf32>
    tpu.vector_store %arg6[%c0_23, %c0_24], %50 {strides = array<i32>} : memref<2x8xf32, #tpu.memory_space<vmem>>, vector<2x8xf32>,
    return
  }
  func.func @transform_0(%arg0: i32) -> (i32, i32, i32) {
    %c0_i32 = arith.constant 0 : i32
    %c0_i32_0 = arith.constant 0 : i32
    %c0_i32_1 = arith.constant 0 : i32
    return %arg0, %c0_i32, %c0_i32_0 : i32, i32, i32
  }
  func.func @transform_1(%arg0: i32) -> (i32, i32, i32) {
    %c0_i32 = arith.constant 0 : i32
    %c0_i32_0 = arith.constant 0 : i32
    %c0_i32_1 = arith.constant 0 : i32
    %c0_i32_2 = arith.constant 0 : i32
    return %c0_i32, %c0_i32_0, %c0_i32_1 : i32, i32, i32
  }
  func.func @transform_2(%arg0: i32) -> (i32, i32) {
    %c0_i32 = arith.constant 0 : i32
    %c0_i32_0 = arith.constant 0 : i32
    %c0_i32_1 = arith.constant 0 : i32
    return %c0_i32, %c0_i32_0 : i32, i32
  }
  func.func @transform_3(%arg0: i32) -> (i32, i32) {
    %c0_i32 = arith.constant 0 : i32
    %c0_i32_0 = arith.constant 0 : i32
    %c0_i32_1 = arith.constant 0 : i32
    return %c0_i32, %c0_i32_0 : i32, i32
  }
  func.func @transform_4(%arg0: i32) -> (i32, i32) {
    %c0_i32 = arith.constant 0 : i32
    %c0_i32_0 = arith.constant 0 : i32
    %c0_i32_1 = arith.constant 0 : i32
    return %c0_i32, %c0_i32_0 : i32, i32
  }
  func.func @transform_5(%arg0: i32) -> (i32, i32) {
    %c0_i32 = arith.constant 0 : i32
    %c0_i32_0 = arith.constant 0 : i32
    return %arg0, %c0_i32 : i32, i32
  }
}

</mosaic_0001>

<bundles_post_ra>
// kernel: tpu_custom_call.1
= control target key start
LH: loop header
LB: loop body
LE: loop exit
PB: predicated region body
PF: predicated region fallthrough
CT: control target
= control target key end

     0   :  { %vm46_vm0 = vcmask 1046528   ;;  %vm80_vm1 = vcmask 261120   ;;  %vm203_vm2 = vcmask 1045504   ;;  %s752_s0 = inlined_call_operand.vmem [shape: bf16[2,18,32], index: 0, kind: input, shape index: {}]   ;;  %s753_s1 = inlined_call_operand.vmem [shape: bf16[3,32,64], index: 1, kind: input, shape index: {}]   ;;  %s754_s2 = inlined_call_operand.vmem [shape: f32[1,64], index: 2, kind: input, shape index: {}]   ;;  %s755_s3 = inlined_call_operand.vmem [shape: f32[16,64], index: 3, kind: input, shape index: {}]   ;;  %s756_s4 = inlined_call_operand.vmem [shape: f32[64,8], index: 4, kind: input, shape index: {}]   ;;  %s757_s5 = inlined_call_operand.hbm [shape: f32[2,8], index: 5, kind: output, shape index: {}]  }
   0x1   :  { %v597_v0 = vld [vmem:[%s753_s1 + $0x18] sm:$0xff]   ;;  %v598_v1 = vld [vmem:[%s753_s1 + $0x8] sm:$0xff]   ;;  %v599_v2 = vld [vmem:[%s753_s1 + $0x10] sm:$0xff]  }
   0x2   :  { %550 = vmatprep.subr.bf16.mxu0 %v597_v0  ;;  %558 = vmatprep.subr.bf16.mxu1 %v598_v1  ;;  %v600_v3 = vld [vmem:[%s753_s1] sm:$0xff]   ;;  %v24_v5 = vld [vmem:[%s752_s0 + $0x8] sm:$0x1]  ;;  %v25_v6 = vld [vmem:[%s752_s0 + $0xc] sm:$0xff]  }
   0x3   :  { %551 = vmatpush3.bf16.msra.mxu0 %v597_v0  ;;  %559 = vmatpush3.bf16.msra.mxu1 %v598_v1  ;;  %v22_v4 = vld [vmem:[%s752_s0] sm:$0xff]   ;;  %v30_v9 = vunpack.c.l.bf16 %v24_v5  ;;  %v27_v10 = vld [vmem:[%s752_s0 + $0x14] sm:$0x1]  ;;  %v31_v11 = vunpack.c.l.bf16 %v25_v6  ;;  %v32_v12 = vunpack.c.h.bf16 %v25_v6  ;;  %v603_v14 = vld [vmem:[%s753_s1 + $0x28] sm:$0xff]  }
   0x4   :  { %552 = vmatprep.subr.bf16.mxu0 %v599_v2  ;;  %560 = vmatprep.subr.bf16.mxu1 %v600_v3  ;;  %v28_v7 = vunpack.c.l.bf16 %v22_v4  ;;  %v29_v8 = vunpack.c.h.bf16 %v22_v4  ;;  %v33_v13 = vunpack.c.l.bf16 %v27_v10 }
   0x5   :  { %v50_v17 = vrot.slane %v30_v9, 1  ;;  %562 = vmatprep.mubr.msk.bf16.mxu1 %vm80_vm1, %v22_v4  ;;  %v207_v20 = vrot.slane %v30_v9, 2  ;;  %v52_v21 = vrot.slane %v31_v11, 1  ;;  %v53_v22 = vrot.slane %v32_v12, 1 }
   0x6   :  { %v47_v15 = vrot.slane %v28_v7, 1  ;;  %v48_v16 = vrot.slane %v29_v8, 1  ;;  %v204_v18 = vrot.slane %v28_v7, 2  ;;  %v205_v19 = vrot.slane %v29_v8, 2 }
   0x7   :  { %553 = vmatpush3.bf16.msra.mxu0 %v599_v2  ;;  %561 = vmatpush3.bf16.msra.mxu1 %v600_v3 }
   0x8   :  { %566 = vmatprep.subr.bf16.mxu0 %v603_v14 }
   0x9   :  { %10 = vsyncpa [#allocation3], 0  ;;  %v49_v23 = vsel %vm46_vm0, %v47_v15, %v48_v16  ;;  %v51_v24 = vsel %vm46_vm0, %v48_v16, %v50_v17  ;;  %v55_v25 = vrot.slane %v33_v13, 1  ;;  %v54_v27 = vsel %vm46_vm0, %v52_v21, %v53_v22  ;;  %v604_v35 = vld [vmem:[%s753_s1 + $0x20] sm:$0xff]   ;;  %v324_v40 = vld [vmem:[%s756_s4 + $0x38] sm:$0xff] }
   0xa   :  { %v61_v26 = vpack.c.bf16 %v51_v24, %v49_v23  ;;  %v209_v28 = vrot.slane %v31_v11, 2  ;;  %v210_v29 = vrot.slane %v32_v12, 2  ;;  %v212_v31 = vrot.slane %v33_v13, 2  ;;  %563 = vmatmul.mubr.msk.bf16.vlgmr.msra.gmra.mxu1 %vm80_vm1, %v25_v6  ;;  %574 = vmatprep.subr.mxu1 %v324_v40  ;;  %v323_v41 = vld [vmem:[%s756_s4 + $0x30] sm:$0xff]  ;;  %v322_v42 = vld [vmem:[%s756_s4 + $0x28] sm:$0xff]  ;;  %v321_v43 = vld [vmem:[%s756_s4 + $0x20] sm:$0xff] }
   0xb   :  { %v56_v30 = vsel %vm46_vm0, %v53_v22, %v55_v25  ;;  %v206_v32 = vsel %vm203_vm2, %v204_v18, %v205_v19  ;;  %v208_v33 = vsel %vm203_vm2, %v205_v19, %v207_v20  ;;  %575 = vmatpush3.msra.mxu1 %v324_v40  ;;  %v320_v44 = vld [vmem:[%s756_s4 + $0x18] sm:$0xff]  ;;  %v319_v45 = vld [vmem:[%s756_s4 + $0x10] sm:$0xff]  ;;  %v318_v46 = vld [vmem:[%s756_s4 + $0x8] sm:$0xff]  ;;  %vm325_vm3 = vcmask 523264  }
   0xc   :  { %554 = vmatprep.mubr.msk.bf16.mxu0 %vm80_vm1, %v61_v26  ;;  %v62_v34 = vpack.c.bf16 %v56_v30, %v54_v27  ;;  %v218_v36 = vpack.c.bf16 %v208_v33, %v206_v32  ;;  %v211_v37 = vsel %vm203_vm2, %v209_v28, %v210_v29  ;;  %v213_v38 = vsel %vm203_vm2, %v210_v29, %v212_v31  ;;  %v317_v47 = vld [vmem:[%s756_s4] sm:$0xff] }
   0xd   :  { %v219_v39 = vpack.c.bf16 %v213_v38, %v211_v37  ;;  %576 = vmatprep.subr.mxu1 %v323_v41  ;;  %v521_v62 = vld [vmem:[%s754_s2] ss:$0 sm:$0xff]  ;;  %vm423_vm4 = vcmask 64512   ;;  %vm444_vm5 = vcmask 1041409   ;;  %vm447_vm6 = vcmask 58368  }
   0xe   :  { %555 = vmatmul.mubr.msk.bf16.vlgmr.msra.gmra.mxu0 %vm80_vm1, %v62_v34  ;;  %577 = vmatpush3.msra.mxu1 %v323_v41  ;;  %v311_v8 = vld [vmem:[%s755_s3] sm:$0xff] }
   0xf   :  { %567 = vmatpush3.bf16.msra.mxu0 %v603_v14  ;;  %570 = vmatprep.mubr.msk.bf16.mxu0 %vm80_vm1, %v218_v36  ;;  %v312_v14 = vld [vmem:[%s755_s3 + $0x8] sm:$0xff]  ;;  %s635_s3 = smov [#allocation2]  }
  0x10   :  { %568 = vmatprep.subr.bf16.mxu0 %v604_v35  ;;  %578 = vmatprep.subr.mxu1 %v322_v42  ;;  %s491_s6 = sshll.u32 %s635_s3, 4  ;;  %s492_s6 = int_to_ptr.vmem [resolvable:$true] %s491_s6 }
  0x11   :  { %579 = vmatpush3.msra.mxu1 %v322_v42  ;;  %s613_s7 = scalar_lea.vmem %s492_s6, 32  ;;  %p618_p1 = scmp.lt.s32.totalorder %s492_s6, %s492_s6 }
  0x12   :  { %580 = vmatprep.subr.mxu1 %v321_v43  ;;  %p614_p0 = scmp.ne.s32.totalorder %s492_s6, %s613_s7  ;;  %p619_p2 = scmp.lt.s32.totalorder %s613_s7, %s613_s7 }
  0x13   :  { %569 = vmatpush3.bf16.msra.mxu0 %v604_v35  ;;  %581 = vmatpush3.msra.mxu1 %v321_v43 }
  0x14   :  { %582 = vmatprep.subr.mxu1 %v320_v44  ;;  %p620_p3 = por %p619_p2, %p618_p1 }
  0x15   :  { %583 = vmatpush3.msra.mxu1 %v320_v44 }
  0x16   :  { %571 = vmatmul.mubr.msk.bf16.vlgmr.msra.gmra.mxu0 %vm80_vm1, %v219_v39  ;;  %584 = vmatprep.subr.mxu1 %v319_v45  ;;  %p621_p4 = pnand %p620_p3, %p614_p0 }
  0x17   :  { %585 = vmatpush3.msra.mxu1 %v319_v45 }
  0x18   :  { %586 = vmatprep.subr.mxu1 %v318_v46 }
  0x19   :  { %587 = vmatpush3.msra.mxu1 %v318_v46 }
  0x1a   :  { %588 = vmatprep.subr.mxu1 %v317_v47 }
  0x1b   :  { %589 = vmatpush3.msra.mxu1 %v317_v47 }
  0xca   :  { %v564_v48 = vpop.f32.mrf.mxu1 }
  0xcc   :  { %v188_v51 = vpop.f32.mrf.mxu1 }
  0xce   :  { %v556_v49 = vpop.f32.mrf.mxu0  ;;  %v565_v53 = vpop.f32.mrf.mxu1 }
  0xcf   :  { %v197_v55 = vadd.f32 %v564_v48, %v556_v49 }
  0xd0   :  { %v121_v50 = vpop.f32.mrf.mxu0  ;;  %v191_v58 = vpop.f32.mrf.mxu1 }
  0xd1   :  { %v189_v57 = vadd.f32 %v188_v51, %v121_v50 }
  0xd2   :  { %v557_v52 = vpop.f32.mrf.mxu0 }
  0xd3   :  { %v200_v61 = vadd.f32 %v565_v53, %v557_v52 }
  0xd4   :  { %v124_v54 = vpop.f32.mrf.mxu0 }
  0xd5   :  { %v192_v1 = vadd.f32 %v191_v58, %v124_v54 }
  0xd6   :  { %v572_v56 = vpop.f32.mrf.mxu0 }
  0xd7   :  { %v294_v59 = vadd.f32 %v572_v56, %v197_v55 }
  0xd8   :  { %v277_v60 = vpop.f32.mrf.mxu0 }
  0xd9   :  { %v292_v63 = vadd.f32 %v277_v60, %v189_v57  ;;  %v305_v4 = vadd.f32 %v521_v62, %v294_v59 }
  0xda   :  { %v573_v0 = vpop.f32.mrf.mxu0 }
  0xdb   :  { %v303_v2 = vadd.f32 %v521_v62, %v292_v63  ;;  %v295_v3 = vadd.f32 %v573_v0, %v200_v61  ;;  %v309_v12 = vmax.f32 %v305_v4, 0.0 }
  0xdc   :  { %v280_v5 = vpop.f32.mrf.mxu0 }
  0xdd   :  { %v307_v6 = vmax.f32 %v303_v2, 0.0  ;;  %v293_v7 = vadd.f32 %v280_v5, %v192_v1  ;;  %v306_v10 = vadd.f32 %v521_v62, %v295_v3  ;;  %v315_v17 = vmul.f32 %v311_v8, %v309_v12 }
  0xdf   :  { %v313_v9 = vmul.f32 %v311_v8, %v307_v6  ;;  %v304_v11 = vadd.f32 %v521_v62, %v293_v7  ;;  %v310_v15 = vmax.f32 %v306_v10, 0.0 }
  0xe1   :  { %v308_v13 = vmax.f32 %v304_v11, 0.0  ;;  %590 = vmatprep.mubr.msk.f32.mxu1 %vm325_vm3, %v313_v9  ;;  %v316_v18 = vmul.f32 %v312_v14, %v310_v15 }
  0xe3   :  { %v314_v16 = vmul.f32 %v312_v14, %v308_v13 }
  0xe5   :  { %591 = vmatmul.mubr.msk.f32.vlgmr.msra.gmra.mxu1 %vm325_vm3, %v314_v16 }
  0xe6   :  { %593 = vmatprep.mubr.msk.f32.mxu1 %vm325_vm3, %v315_v17 }
  0xe9   :  { %594 = vmatmul.mubr.msk.f32.gmra.mxu1 %vm325_vm3, %v316_v18 }
 0x1a5   :  { %v592_v19 = vpop.f32.mrf.mxu1 }
 0x1a6   :  { %v425_v21 = vsel %vm423_vm4, %v592_v19, 0.0 }
 0x1a7   :  { %v404_v20 = vpop.f32.mrf.mxu1 }
 0x1a8   :  { %v424_v22 = vsel %vm423_vm4, %v404_v20, 0.0 }
 0x1a9   :  { %v426_v23 = vadd.f32 %v425_v21, %v424_v22  ;;  %v595_v24 = vpop.f32.mrf.mxu1 }
 0x1aa   :  { %v434_v27 = vsel %vm423_vm4, %v595_v24, 0.0 }
 0x1ab   :  { %v427_v25 = vrot.slane %v426_v23, 4  ;;  %v414_v26 = vpop.f32.mrf.mxu1 }
 0x1ac   :  { %v433_v28 = vsel %vm423_vm4, %v414_v26, 0.0 }
 0x1ad   :  { %v428_v29 = vadd.f32 %v427_v25, %v426_v23  ;;  %v435_v30 = vadd.f32 %v434_v27, %v433_v28 }
 0x1af   :  { %v429_v31 = vrot.slane %v428_v29, 2  ;;  %v436_v32 = vrot.slane %v435_v30, 4 }
 0x1b1   :  { %v430_v33 = vadd.f32 %v429_v31, %v428_v29  ;;  %v437_v34 = vadd.f32 %v436_v32, %v435_v30 }
 0x1b3   :  { %v438_v35 = vrot.slane %v437_v34, 2  ;;  %v431_v37 = vrot.slane %v430_v33, 1 }
 0x1b5   :  { %v439_v36 = vadd.f32 %v438_v35, %v437_v34  ;;  %v432_v39 = vadd.f32 %v431_v37, %v430_v33 }
 0x1b7   :  { %v440_v38 = vrot.slane %v439_v36, 1 }
 0x1b9   :  { %v441_v40 = vadd.f32 %v440_v38, %v439_v36 }
 0x1bb   :  { %v445_v41 = vsel %vm444_vm5, %v441_v40, %v432_v39 }
 0x1bc   :  { %v448_v42 = vsel %vm447_vm6, %v445_v41, -inf }
 0x1bd   :  { %449 = vmax.xlane.f32.xlu0 %v448_v42 }
 0x246   :  { %v450_v43 = vpop.xlane.xlu0 %449 }
 0x247   :  { %v452_v44 = vrot.slane %v450_v43, 1  ;;  %v455_v45 = vsub.f32 %v432_v39, %v450_v43 }
 0x249   :  { %v456_v46 = vsub.f32 %v441_v40, %v452_v44  ;;  %v457_v47 = vmul.f32 1.442695, %v455_v45 }
 0x24b   :  { %v459_v48 = vmul.f32 1.442695, %v456_v46 }
 0x24d   :  { %607 = vpow2.f32 %v459_v48 }
 0x24e   :  { %609 = vpow2.f32 %v457_v47 }
 0x25a   :  { %v608_v49 = vpop.eup %607 }
 0x25b   :  { %v463_v50 = vrot.slane %v608_v49, 7  ;;  %v610_v51 = vpop.eup %609 }
 0x25d   :  { %v464_v52 = vsel %vm444_vm5, %v463_v50, %v610_v51 }
 0x25e   :  { %v466_v53 = vsel %vm447_vm6, %v464_v52, 0.0 }
 0x25f   :  { %467 = vadd.xlane.f32.xlu0 %v466_v53 }
 0x2e8   :  { %v468_v54 = vpop.xlane.xlu0 %467 }
 0x2e9   :  { %611 = vrcp.f32 %v468_v54 }
 0x2f6   :  { %v612_v55 = vpop.eup %611 }
 0x2f7   :  { %v470_v56 = vmul.f32 %v612_v55, %v468_v54 }
 0x2f9   :  { %v471_v57 = vsub.f32 2.0, %v470_v56 }
 0x2fb   :  { %v472_v58 = vmul.f32 %v612_v55, %v471_v57 }
 0x2fd   :  { %v474_v59 = vrot.slane %v472_v58, 1  ;;  %v477_v61 = vmul.f32 %v610_v51, %v472_v58 }
 0x2ff   :  { %v478_v60 = vmul.f32 %v608_v49, %v474_v59 }
 0x301   :  { %v481_v62 = vrot.slane %v478_v60, 7 }
 0x303   :  { %v482_v63 = vsel %vm444_vm5, %v481_v62, %v477_v61 }
 0x304   :  { %484 = vst.msk [vmem:[#allocation2] sm:$0x3] %vm447_vm6, %v482_v63 }
 0x305   :  { %624 = shalt.err (!%p621_p4)
}
 0x306   :  { %494 = dma.vmem_to_hbm [thread:$0]  %s492_s6, 32, %s757_s5, [#allocation3]  }
 0x307   :  { %633 = dma.done.wait [#allocation3], 32  }
 0x308   :  { %634 = vsyncadd [#allocation3], 4294967264 }
 0x309   :  { %498 = vsyncpa [#allocation3], 1 }

</bundles_post_ra>
